<compile_context>
chip_gen: v7x
topology: tpu7x:2x2x1
jax: 0.10.0
libtpu: 0.0.40
codegen_flags: <defaults>
</compile_context>

<pallas_src>
import functools

import jax
import jax.numpy as jnp
from jax import lax
from jax.experimental import pallas as pl
from jax.experimental.pallas import tpu as pltpu


def _round_up(n, m):
    return (n + m - 1) // m * m


def _tpu_vmem_capacity_bytes():
    try:
        return int(pltpu.get_tpu_info().vmem_capacity_bytes)
    except Exception:
        return 128 * 1024 * 1024  # v5e/v6e default


def _num_tensorcores():
    try:
        return max(1, int(getattr(jax.devices()[0], "num_cores", 1)))
    except Exception:
        return 1


def _select_tiles(B, S, H_pad, tile_budget_bytes, num_cores):
    """Pick (b_tile, B_pad, t_chunk, S_pad) so the double-buffered blocks fit VMEM."""
    itemsize = 4  # f32
    b_tile = min(_round_up(B, 8), 256)
    if num_cores > 1 and B >= 8 * num_cores:
        # At least one batch tile per TensorCore (v7x) so the "parallel" axis feeds
        # all cores; harmless (not triggered) on single-TC chips.
        b_tile = min(b_tile, _round_up(-(-B // num_cores), 8))
    B_pad = _round_up(B, b_tile)

    # Per unit of t_chunk: p input (x2 pipeline buffers), batch-first out (x2),
    # time-major chunk scratch (x1).
    per_t = 5 * b_tile * H_pad * itemsize
    # Fixed: W_hh (x2 buffers), running-hidden scratch, final-hidden output (x2).
    fixed = 2 * H_pad * H_pad * itemsize + 3 * b_tile * H_pad * itemsize
    t_max = max(8, ((tile_budget_bytes - fixed) // per_t) // 8 * 8)
    t_chunk = min(_round_up(S, 8), t_max, 512)
    S_pad = _round_up(S, t_chunk)
    return b_tile, B_pad, t_chunk, S_pad


def encoder_rnn_kernel(p_ref, w_hh_ref, out_ref, hid_ref, h_scr, chunk_scr, *,
                       seq_len, padded_len):
    """One (batch-tile, time-chunk) grid step of the Elman RNN.

    p_ref    : (t_chunk, b_tile, H_pad)  precomputed x@W_ih^T + b, time-major (VMEM)
    w_hh_ref : (H_pad, H_pad)            hidden->hidden weight, transposed, zero padded
    out_ref  : (b_tile, t_chunk, H_pad)  batch-first output block
    hid_ref  : (b_tile, H_pad)           final hidden state for this batch tile
    h_scr    : (b_tile, H_pad)           running hidden state (persists across chunks)
    chunk_scr: (t_chunk, b_tile, H_pad)  time-major per-chunk output buffer
    """
    ti = pl.program_id(1)
    t_chunk = p_ref.shape[0]

    @pl.when(ti == 0)
    def _init():
        h_scr[...] = jnp.zeros_like(h_scr)

    w_hh = w_hh_ref[...]
    base = ti * t_chunk
    needs_mask = padded_len != seq_len  # static: only trace the mask if S was padded

    def step(t, h):
        # Serial chain per step: one (b_tile,H_pad)x(H_pad,H_pad) MXU matmul + tanh.
        h_new = jnp.tanh(p_ref[t]
                         + jnp.dot(h, w_hh, preferred_element_type=jnp.float32))
        if needs_mask:
            h_new = jnp.where(base + t < seq_len, h_new, h)  # freeze on padded steps
        chunk_scr[t] = h_new                                  # dense leading-axis store
        return h_new

    h = lax.fori_loop(0, t_chunk, step, h_scr[...], unroll=min(8, t_chunk))
    h_scr[...] = h

    # One transpose per chunk (XLU, hidden under the pipeline) + one dense
    # batch-first block store; removes the wrapper-level XLA transpose entirely.
    out_ref[...] = pltpu.einshape("tbh->bth", chunk_scr[...]).astype(out_ref.dtype)

    @pl.when(ti == pl.num_programs(1) - 1)
    def _store_final_hidden():
        hid_ref[...] = h.astype(hid_ref.dtype)


def encoder_rnn_forward(x, w_ih, w_hh, b_ih, b_hh):
    """Matches torch.nn.RNN(input_size, hidden_size, batch_first=True) forward with a
    zero initial hidden state.  Returns (outputs (B,S,H), hidden (1,B,H))."""
    B, S, I = x.shape
    H = w_hh.shape[0]
    H_pad = _round_up(H, 128)
    f32 = jnp.float32

    vmem_cap = _tpu_vmem_capacity_bytes()
    vmem_limit = min(vmem_cap * 3 // 4, 96 * 1024 * 1024)     # 48 MiB on v7x, 96 on v5e/v6e
    tile_budget = vmem_limit * 3 // 4
    b_tile, B_pad, t_chunk, S_pad = _select_tiles(B, S, H_pad, tile_budget,
                                                  _num_tensorcores())

    # Hoisted, time-independent input projection (one XLA GEMM); zero padding keeps
    # padded hidden units exactly 0.  Produced time-major so kernel reads are dense.
    w_ih_t = jnp.zeros((I, H_pad), f32).at[:, :H].set(jnp.transpose(w_ih).astype(f32))
    bias = jnp.zeros((H_pad,), f32).at[:H].set((b_ih + b_hh).astype(f32))
    p = jnp.einsum("bsi,ih->sbh", x.astype(f32), w_ih_t) + bias
    p_tm = jnp.zeros((S_pad, B_pad, H_pad), f32).at[:S, :B, :].set(p)

    w_hh_t = jnp.zeros((H_pad, H_pad), f32).at[:H, :H].set(jnp.transpose(w_hh).astype(f32))

    grid = (B_pad // b_tile, S_pad // t_chunk)
    kernel = functools.partial(encoder_rnn_kernel, seq_len=S, padded_len=S_pad)

    out_p, hid_p = pl.pallas_call(
        kernel,
        out_shape=(
            jax.ShapeDtypeStruct((B_pad, S_pad, H_pad), f32),   # batch-first outputs
            jax.ShapeDtypeStruct((B_pad, H_pad), f32),          # final hidden state
        ),
        grid_spec=pltpu.PrefetchScalarGridSpec(
            num_scalar_prefetch=0,
            grid=grid,
            in_specs=[
                pl.BlockSpec((t_chunk, b_tile, H_pad), lambda bi, ti: (ti, bi, 0)),
                # Grid-invariant: fetched once.  TODO(synk): pipeline_mode=pl.Buffered(1)
                # would drop the unused 2nd buffer; the VMEM budget above charges it.
                pl.BlockSpec((H_pad, H_pad), lambda bi, ti: (0, 0)),
            ],
            out_specs=(
                pl.BlockSpec((b_tile, t_chunk, H_pad), lambda bi, ti: (bi, ti, 0)),
                pl.BlockSpec((b_tile, H_pad), lambda bi, ti: (bi, 0)),
            ),
            scratch_shapes=[
                pltpu.VMEM((b_tile, H_pad), f32),             # running hidden state
                pltpu.VMEM((t_chunk, b_tile, H_pad), f32),    # time-major chunk buffer
            ],
        ),
        compiler_params=pltpu.CompilerParams(
            dimension_semantics=("parallel", "arbitrary"),
            vmem_limit_bytes=int(vmem_limit),
        ),
    )(p_tm, w_hh_t)

    outputs = out_p[:B, :S, :H]             # (B, S, H) -- already batch-first
    hidden = hid_p[:B, :H][None, :, :]      # (1, B, H)
    return outputs, hidden


def encoder_rnn_reference(x, w_ih, w_hh, b_ih, b_hh):
    """Pure-JAX reference of nn.RNN forward for validation."""
    B, S, I = x.shape
    H = w_hh.shape[0]
    h0 = jnp.zeros((B, H), jnp.float32)

    def step(h, x_t):
        h_new = jnp.tanh(x_t @ w_ih.T + b_ih + h @ w_hh.T + b_hh)
        return h_new, h_new

    h_final, outs = jax.lax.scan(step, h0, jnp.transpose(x, (1, 0, 2)))
    return jnp.transpose(outs, (1, 0, 2)), h_final[None]


if __name__ == "__main__":
    input_size = 5
    hidden_size = 10
    batch = 2
    seq = 8

    key = jax.random.PRNGKey(0)
    k_x, k_wih, k_whh, k_bih, k_bhh = jax.random.split(key, 5)

    # PyTorch default init: U(-1/sqrt(hidden_size), 1/sqrt(hidden_size))
    bound = 1.0 / (hidden_size ** 0.5)
    w_ih = jax.random.uniform(k_wih, (hidden_size, input_size), jnp.float32, -bound, bound)
    w_hh = jax.random.uniform(k_whh, (hidden_size, hidden_size), jnp.float32, -bound, bound)
    b_ih = jax.random.uniform(k_bih, (hidden_size,), jnp.float32, -bound, bound)
    b_hh = jax.random.uniform(k_bhh, (hidden_size,), jnp.float32, -bound, bound)

    x = jax.random.normal(k_x, (batch, seq, input_size), jnp.float32)

    outputs, hidden = encoder_rnn_forward(x, w_ih, w_hh, b_ih, b_hh)
    jax.block_until_ready((outputs, hidden))

    ref_out, ref_hid = encoder_rnn_reference(x, w_ih, w_hh, b_ih, b_hh)
    assert outputs.shape == (batch, seq, hidden_size)
    assert hidden.shape == (1, batch, hidden_size)
    assert jnp.allclose(outputs, ref_out, atol=1e-5, rtol=1e-5)
    assert jnp.allclose(hidden, ref_hid, atol=1e-5, rtol=1e-5)

    print("KERNEL_OK")
</pallas_src>

<mosaic_0001>
module attributes {stable_mosaic.version = 11 : i64} {
  func.func @encoder_rnn_kernel(%arg0: i32, %arg1: i32, %arg2: memref<8x8x128xf32, #tpu.memory_space<vmem>>, %arg3: memref<128x128xf32, #tpu.memory_space<vmem>>, %arg4: memref<8x8x128xf32, #tpu.memory_space<vmem>>, %arg5: memref<8x128xf32, #tpu.memory_space<vmem>>, %arg6: memref<8x128xf32, #tpu.memory_space<vmem>>, %arg7: memref<8x8x128xf32, #tpu.memory_space<vmem>>) attributes {dimension_semantics = [#tpu.dimension_semantics<parallel>, #tpu.dimension_semantics<arbitrary>], iteration_bounds = array<i64: 1, 1>, scalar_prefetch = 0 : i64, scratch_operands = 2 : i64, tpu.core_type = #tpu.core_type<tc>, window_params = [{transform_indices = @transform_0, window_bounds = array<i64: 8, 8, 128>}, {pipeline_mode = #tpu.pipeline_mode<synchronous>, transform_indices = @transform_1, window_bounds = array<i64: 128, 128>}, {transform_indices = @transform_2, window_bounds = array<i64: 8, 8, 128>}, {transform_indices = @transform_3, window_bounds = array<i64: 8, 128>}]} {
    %c0_i32 = arith.constant 0 : i32
    %0 = arith.cmpi eq, %arg1, %c0_i32 : i32
    %1 = arith.extui %0 : i1 to i32
    %c0_i32_0 = arith.constant 0 : i32
    %2 = arith.cmpi ne, %1, %c0_i32_0 : i32
    scf.if %2 {
      %cst_54 = arith.constant 0.000000e+00 : f32
      %92 = vector.broadcast %cst_54 : f32 to vector<8x128xf32>
      %c0_55 = arith.constant 0 : index
      %c0_56 = arith.constant 0 : index
      %93 = vector.load %arg6[%c0_55, %c0_56] : memref<8x128xf32, #tpu.memory_space<vmem>>, vector<8x128xf32>
      tpu.vector_store %arg6[%c0_55, %c0_56], %92 {strides = array<i32>} : memref<8x128xf32, #tpu.memory_space<vmem>>, vector<8x128xf32>,
    } else {
    }
    %c0 = arith.constant 0 : index
    %c0_1 = arith.constant 0 : index
    %3 = vector.load %arg3[%c0, %c0_1] : memref<128x128xf32, #tpu.memory_space<vmem>>, vector<128x128xf32>
    %c0_2 = arith.constant 0 : index
    %c0_3 = arith.constant 0 : index
    %4 = vector.load %arg6[%c0_2, %c0_3] : memref<8x128xf32, #tpu.memory_space<vmem>>, vector<8x128xf32>
    %c0_i32_4 = arith.constant 0 : i32
    %5 = arith.index_cast %c0_i32_4 : i32 to index
    %c0_5 = arith.constant 0 : index
    %c0_6 = arith.constant 0 : index
    %6 = vector.load %arg2[%5, %c0_5, %c0_6] : memref<8x8x128xf32, #tpu.memory_space<vmem>>, vector<1x8x128xf32>
    %7 = vector.shape_cast %6 : vector<1x8x128xf32> to vector<8x128xf32>
    %cst = arith.constant dense<0.000000e+00> : vector<8x128xf32>
    %8 = tpu.matmul %4, %3, %cst {dimension_numbers = #tpu.dot_dimension_numbers<[1], [0], [0], [1], [0, 0, 1, 1], [], []>} : vector<8x128xf32>, vector<128x128xf32>, vector<8x128xf32> -> vector<8x128xf32>
    %9 = arith.addf %7, %8 : vector<8x128xf32>
    %10 = math.tanh %9 : vector<8x128xf32>
    %11 = arith.index_cast %c0_i32_4 : i32 to index
    %c0_7 = arith.constant 0 : index
    %c0_8 = arith.constant 0 : index
    %12 = vector.load %arg7[%11, %c0_7, %c0_8] : memref<8x8x128xf32, #tpu.memory_space<vmem>>, vector<1x8x128xf32>
    %13 = vector.shape_cast %12 : vector<1x8x128xf32> to vector<8x128xf32>
    %14 = vector.shape_cast %10 : vector<8x128xf32> to vector<1x8x128xf32>
    tpu.vector_store %arg7[%11, %c0_7, %c0_8], %14 {strides = array<i32>} : memref<8x8x128xf32, #tpu.memory_space<vmem>>, vector<1x8x128xf32>,
    %c1_i32 = arith.constant 1 : i32
    %15 = arith.index_cast %c1_i32 : i32 to index
    %c0_9 = arith.constant 0 : index
    %c0_10 = arith.constant 0 : index
    %16 = vector.load %arg2[%15, %c0_9, %c0_10] : memref<8x8x128xf32, #tpu.memory_space<vmem>>, vector<1x8x128xf32>
    %17 = vector.shape_cast %16 : vector<1x8x128xf32> to vector<8x128xf32>
    %cst_11 = arith.constant dense<0.000000e+00> : vector<8x128xf32>
    %18 = tpu.matmul %10, %3, %cst_11 {dimension_numbers = #tpu.dot_dimension_numbers<[1], [0], [0], [1], [0, 0, 1, 1], [], []>} : vector<8x128xf32>, vector<128x128xf32>, vector<8x128xf32> -> vector<8x128xf32>
    %19 = arith.addf %17, %18 : vector<8x128xf32>
    %20 = math.tanh %19 : vector<8x128xf32>
    %21 = arith.index_cast %c1_i32 : i32 to index
    %c0_12 = arith.constant 0 : index
    %c0_13 = arith.constant 0 : index
    %22 = vector.load %arg7[%21, %c0_12, %c0_13] : memref<8x8x128xf32, #tpu.memory_space<vmem>>, vector<1x8x128xf32>
    %23 = vector.shape_cast %22 : vector<1x8x128xf32> to vector<8x128xf32>
    %24 = vector.shape_cast %20 : vector<8x128xf32> to vector<1x8x128xf32>
    tpu.vector_store %arg7[%21, %c0_12, %c0_13], %24 {strides = array<i32>} : memref<8x8x128xf32, #tpu.memory_space<vmem>>, vector<1x8x128xf32>,
    %c2_i32 = arith.constant 2 : i32
    %25 = arith.index_cast %c2_i32 : i32 to index
    %c0_14 = arith.constant 0 : index
    %c0_15 = arith.constant 0 : index
    %26 = vector.load %arg2[%25, %c0_14, %c0_15] : memref<8x8x128xf32, #tpu.memory_space<vmem>>, vector<1x8x128xf32>
    %27 = vector.shape_cast %26 : vector<1x8x128xf32> to vector<8x128xf32>
    %cst_16 = arith.constant dense<0.000000e+00> : vector<8x128xf32>
    %28 = tpu.matmul %20, %3, %cst_16 {dimension_numbers = #tpu.dot_dimension_numbers<[1], [0], [0], [1], [0, 0, 1, 1], [], []>} : vector<8x128xf32>, vector<128x128xf32>, vector<8x128xf32> -> vector<8x128xf32>
    %29 = arith.addf %27, %28 : vector<8x128xf32>
    %30 = math.tanh %29 : vector<8x128xf32>
    %31 = arith.index_cast %c2_i32 : i32 to index
    %c0_17 = arith.constant 0 : index
    %c0_18 = arith.constant 0 : index
    %32 = vector.load %arg7[%31, %c0_17, %c0_18] : memref<8x8x128xf32, #tpu.memory_space<vmem>>, vector<1x8x128xf32>
    %33 = vector.shape_cast %32 : vector<1x8x128xf32> to vector<8x128xf32>
    %34 = vector.shape_cast %30 : vector<8x128xf32> to vector<1x8x128xf32>
    tpu.vector_store %arg7[%31, %c0_17, %c0_18], %34 {strides = array<i32>} : memref<8x8x128xf32, #tpu.memory_space<vmem>>, vector<1x8x128xf32>,
    %c3_i32 = arith.constant 3 : i32
    %35 = arith.index_cast %c3_i32 : i32 to index
    %c0_19 = arith.constant 0 : index
    %c0_20 = arith.constant 0 : index
    %36 = vector.load %arg2[%35, %c0_19, %c0_20] : memref<8x8x128xf32, #tpu.memory_space<vmem>>, vector<1x8x128xf32>
    %37 = vector.shape_cast %36 : vector<1x8x128xf32> to vector<8x128xf32>
    %cst_21 = arith.constant dense<0.000000e+00> : vector<8x128xf32>
    %38 = tpu.matmul %30, %3, %cst_21 {dimension_numbers = #tpu.dot_dimension_numbers<[1], [0], [0], [1], [0, 0, 1, 1], [], []>} : vector<8x128xf32>, vector<128x128xf32>, vector<8x128xf32> -> vector<8x128xf32>
    %39 = arith.addf %37, %38 : vector<8x128xf32>
    %40 = math.tanh %39 : vector<8x128xf32>
    %41 = arith.index_cast %c3_i32 : i32 to index
    %c0_22 = arith.constant 0 : index
    %c0_23 = arith.constant 0 : index
    %42 = vector.load %arg7[%41, %c0_22, %c0_23] : memref<8x8x128xf32, #tpu.memory_space<vmem>>, vector<1x8x128xf32>
    %43 = vector.shape_cast %42 : vector<1x8x128xf32> to vector<8x128xf32>
    %44 = vector.shape_cast %40 : vector<8x128xf32> to vector<1x8x128xf32>
    tpu.vector_store %arg7[%41, %c0_22, %c0_23], %44 {strides = array<i32>} : memref<8x8x128xf32, #tpu.memory_space<vmem>>, vector<1x8x128xf32>,
    %c4_i32 = arith.constant 4 : i32
    %45 = arith.index_cast %c4_i32 : i32 to index
    %c0_24 = arith.constant 0 : index
    %c0_25 = arith.constant 0 : index
    %46 = vector.load %arg2[%45, %c0_24, %c0_25] : memref<8x8x128xf32, #tpu.memory_space<vmem>>, vector<1x8x128xf32>
    %47 = vector.shape_cast %46 : vector<1x8x128xf32> to vector<8x128xf32>
    %cst_26 = arith.constant dense<0.000000e+00> : vector<8x128xf32>
    %48 = tpu.matmul %40, %3, %cst_26 {dimension_numbers = #tpu.dot_dimension_numbers<[1], [0], [0], [1], [0, 0, 1, 1], [], []>} : vector<8x128xf32>, vector<128x128xf32>, vector<8x128xf32> -> vector<8x128xf32>
    %49 = arith.addf %47, %48 : vector<8x128xf32>
    %50 = math.tanh %49 : vector<8x128xf32>
    %51 = arith.index_cast %c4_i32 : i32 to index
    %c0_27 = arith.constant 0 : index
    %c0_28 = arith.constant 0 : index
    %52 = vector.load %arg7[%51, %c0_27, %c0_28] : memref<8x8x128xf32, #tpu.memory_space<vmem>>, vector<1x8x128xf32>
    %53 = vector.shape_cast %52 : vector<1x8x128xf32> to vector<8x128xf32>
    %54 = vector.shape_cast %50 : vector<8x128xf32> to vector<1x8x128xf32>
    tpu.vector_store %arg7[%51, %c0_27, %c0_28], %54 {strides = array<i32>} : memref<8x8x128xf32, #tpu.memory_space<vmem>>, vector<1x8x128xf32>,
    %c5_i32 = arith.constant 5 : i32
    %55 = arith.index_cast %c5_i32 : i32 to index
    %c0_29 = arith.constant 0 : index
    %c0_30 = arith.constant 0 : index
    %56 = vector.load %arg2[%55, %c0_29, %c0_30] : memref<8x8x128xf32, #tpu.memory_space<vmem>>, vector<1x8x128xf32>
    %57 = vector.shape_cast %56 : vector<1x8x128xf32> to vector<8x128xf32>
    %cst_31 = arith.constant dense<0.000000e+00> : vector<8x128xf32>
    %58 = tpu.matmul %50, %3, %cst_31 {dimension_numbers = #tpu.dot_dimension_numbers<[1], [0], [0], [1], [0, 0, 1, 1], [], []>} : vector<8x128xf32>, vector<128x128xf32>, vector<8x128xf32> -> vector<8x128xf32>
    %59 = arith.addf %57, %58 : vector<8x128xf32>
    %60 = math.tanh %59 : vector<8x128xf32>
    %61 = arith.index_cast %c5_i32 : i32 to index
    %c0_32 = arith.constant 0 : index
    %c0_33 = arith.constant 0 : index
    %62 = vector.load %arg7[%61, %c0_32, %c0_33] : memref<8x8x128xf32, #tpu.memory_space<vmem>>, vector<1x8x128xf32>
    %63 = vector.shape_cast %62 : vector<1x8x128xf32> to vector<8x128xf32>
    %64 = vector.shape_cast %60 : vector<8x128xf32> to vector<1x8x128xf32>
    tpu.vector_store %arg7[%61, %c0_32, %c0_33], %64 {strides = array<i32>} : memref<8x8x128xf32, #tpu.memory_space<vmem>>, vector<1x8x128xf32>,
    %c6_i32 = arith.constant 6 : i32
    %65 = arith.index_cast %c6_i32 : i32 to index
    %c0_34 = arith.constant 0 : index
    %c0_35 = arith.constant 0 : index
    %66 = vector.load %arg2[%65, %c0_34, %c0_35] : memref<8x8x128xf32, #tpu.memory_space<vmem>>, vector<1x8x128xf32>
    %67 = vector.shape_cast %66 : vector<1x8x128xf32> to vector<8x128xf32>
    %cst_36 = arith.constant dense<0.000000e+00> : vector<8x128xf32>
    %68 = tpu.matmul %60, %3, %cst_36 {dimension_numbers = #tpu.dot_dimension_numbers<[1], [0], [0], [1], [0, 0, 1, 1], [], []>} : vector<8x128xf32>, vector<128x128xf32>, vector<8x128xf32> -> vector<8x128xf32>
    %69 = arith.addf %67, %68 : vector<8x128xf32>
    %70 = math.tanh %69 : vector<8x128xf32>
    %71 = arith.index_cast %c6_i32 : i32 to index
    %c0_37 = arith.constant 0 : index
    %c0_38 = arith.constant 0 : index
    %72 = vector.load %arg7[%71, %c0_37, %c0_38] : memref<8x8x128xf32, #tpu.memory_space<vmem>>, vector<1x8x128xf32>
    %73 = vector.shape_cast %72 : vector<1x8x128xf32> to vector<8x128xf32>
    %74 = vector.shape_cast %70 : vector<8x128xf32> to vector<1x8x128xf32>
    tpu.vector_store %arg7[%71, %c0_37, %c0_38], %74 {strides = array<i32>} : memref<8x8x128xf32, #tpu.memory_space<vmem>>, vector<1x8x128xf32>,
    %c7_i32 = arith.constant 7 : i32
    %75 = arith.index_cast %c7_i32 : i32 to index
    %c0_39 = arith.constant 0 : index
    %c0_40 = arith.constant 0 : index
    %76 = vector.load %arg2[%75, %c0_39, %c0_40] : memref<8x8x128xf32, #tpu.memory_space<vmem>>, vector<1x8x128xf32>
    %77 = vector.shape_cast %76 : vector<1x8x128xf32> to vector<8x128xf32>
    %cst_41 = arith.constant dense<0.000000e+00> : vector<8x128xf32>
    %78 = tpu.matmul %70, %3, %cst_41 {dimension_numbers = #tpu.dot_dimension_numbers<[1], [0], [0], [1], [0, 0, 1, 1], [], []>} : vector<8x128xf32>, vector<128x128xf32>, vector<8x128xf32> -> vector<8x128xf32>
    %79 = arith.addf %77, %78 : vector<8x128xf32>
    %80 = math.tanh %79 : vector<8x128xf32>
    %81 = arith.index_cast %c7_i32 : i32 to index
    %c0_42 = arith.constant 0 : index
    %c0_43 = arith.constant 0 : index
    %82 = vector.load %arg7[%81, %c0_42, %c0_43] : memref<8x8x128xf32, #tpu.memory_space<vmem>>, vector<1x8x128xf32>
    %83 = vector.shape_cast %82 : vector<1x8x128xf32> to vector<8x128xf32>
    %84 = vector.shape_cast %80 : vector<8x128xf32> to vector<1x8x128xf32>
    tpu.vector_store %arg7[%81, %c0_42, %c0_43], %84 {strides = array<i32>} : memref<8x8x128xf32, #tpu.memory_space<vmem>>, vector<1x8x128xf32>,
    %c8_i32 = arith.constant 8 : i32
    %c0_44 = arith.constant 0 : index
    %c0_45 = arith.constant 0 : index
    %85 = vector.load %arg6[%c0_44, %c0_45] : memref<8x128xf32, #tpu.memory_space<vmem>>, vector<8x128xf32>
    tpu.vector_store %arg6[%c0_44, %c0_45], %80 {strides = array<i32>} : memref<8x128xf32, #tpu.memory_space<vmem>>, vector<8x128xf32>,
    %c0_46 = arith.constant 0 : index
    %c0_47 = arith.constant 0 : index
    %c0_48 = arith.constant 0 : index
    %86 = vector.load %arg7[%c0_46, %c0_47, %c0_48] : memref<8x8x128xf32, #tpu.memory_space<vmem>>, vector<8x8x128xf32>
    %87 = tpu.transpose %86, [1, 0, 2] : vector<8x8x128xf32> -> vector<8x8x128xf32>
    %c0_49 = arith.constant 0 : index
    %c0_50 = arith.constant 0 : index
    %c0_51 = arith.constant 0 : index
    %88 = vector.load %arg4[%c0_49, %c0_50, %c0_51] : memref<8x8x128xf32, #tpu.memory_space<vmem>>, vector<8x8x128xf32>
    tpu.vector_store %arg4[%c0_49, %c0_50, %c0_51], %87 {strides = array<i32>} : memref<8x8x128xf32, #tpu.memory_space<vmem>>, vector<8x8x128xf32>,
    %c0_i32_52 = arith.constant 0 : i32
    %89 = arith.cmpi eq, %arg1, %c0_i32_52 : i32
    %90 = arith.extui %89 : i1 to i32
    %c0_i32_53 = arith.constant 0 : i32
    %91 = arith.cmpi ne, %90, %c0_i32_53 : i32
    scf.if %91 {
      %c0_54 = arith.constant 0 : index
      %c0_55 = arith.constant 0 : index
      %92 = vector.load %arg5[%c0_54, %c0_55] : memref<8x128xf32, #tpu.memory_space<vmem>>, vector<8x128xf32>
      tpu.vector_store %arg5[%c0_54, %c0_55], %80 {strides = array<i32>} : memref<8x128xf32, #tpu.memory_space<vmem>>, vector<8x128xf32>,
    } else {
    }
    return
  }
  func.func @transform_0(%arg0: i32, %arg1: i32) -> (i32, i32, i32) {
    %c0_i32 = arith.constant 0 : i32
    %c0_i32_0 = arith.constant 0 : i32
    return %arg1, %arg0, %c0_i32 : i32, i32, i32
  }
  func.func @transform_1(%arg0: i32, %arg1: i32) -> (i32, i32) {
    %c0_i32 = arith.constant 0 : i32
    %c0_i32_0 = arith.constant 0 : i32
    %c0_i32_1 = arith.constant 0 : i32
    return %c0_i32, %c0_i32_0 : i32, i32
  }
  func.func @transform_2(%arg0: i32, %arg1: i32) -> (i32, i32, i32) {
    %c0_i32 = arith.constant 0 : i32
    %c0_i32_0 = arith.constant 0 : i32
    return %arg0, %arg1, %c0_i32 : i32, i32, i32
  }
  func.func @transform_3(%arg0: i32, %arg1: i32) -> (i32, i32) {
    %c0_i32 = arith.constant 0 : i32
    %c0_i32_0 = arith.constant 0 : i32
    return %arg0, %c0_i32 : i32, i32
  }
}

</mosaic_0001>

<bundles_post_ra>
// kernel: tpu_custom_call.1
= control target key start
LH: loop header
LB: loop body
LE: loop exit
PB: predicated region body
PF: predicated region fallthrough
CT: control target
= control target key end

     0   :  { %9 = vsyncpa [#allocation5], 0  ;;  %s1897_s0 = inlined_call_operand.hbm [shape: f32[8,8,128], index: 0, kind: input, shape index: {}]   ;;  %s1898_s1 = inlined_call_operand.hbm [shape: f32[128,128], index: 1, kind: input, shape index: {}]   ;;  %s1899_s2 = inlined_call_operand.hbm [shape: f32[8,8,128], index: 2, kind: output, shape index: {0}]   ;;  %s1900_s3 = inlined_call_operand.hbm [shape: f32[8,128], index: 3, kind: output, shape index: {1}]  }
   0x1   :  { %10 = vsyncpa [#allocation8], 0 }
   0x2   :  { %11 = vsyncpa [#allocation6], 0 }
   0x3   :  { %12 = vsyncpa [#allocation11], 0  ;;  %s1591_s12 = smov [#allocation4]   ;;  %s1495_s16 = scalar_lea.hbm %s1897_s0, 1024 }
   0x4   :  { %s18_s13 = sshll.u32 %s1591_s12, 4  ;;  %p1496_p0 = scmp.ne.s32.totalorder %s1897_s0, %s1495_s16  ;;  %s19_s13 = int_to_ptr.vmem [resolvable:$true] %s18_s13 }
   0x5   :  { %p1499_p1 = scmp.lt.u32.totalorder %s1495_s16, %s1897_s0 }
   0x7   :  { %p1501_p2 = pnand %p1499_p1, %p1496_p0 }
   0x9   :  { %1504 = shalt.err (!%p1501_p2)
}
   0xa   :  { %s1505_s21 = scalar_lea.vmem %s19_s13, 1024  ;;  %p1510_p4 = scmp.lt.s32.totalorder %s19_s13, %s19_s13 }
   0xb   :  { %p1506_p3 = scmp.ne.s32.totalorder %s19_s13, %s1505_s21  ;;  %p1511_p5 = scmp.lt.s32.totalorder %s1505_s21, %s1505_s21 }
   0xd   :  { %p1512_p6 = por %p1511_p5, %p1510_p4 }
   0xf   :  { %p1513_p7 = pnand %p1512_p6, %p1506_p3 }
  0x11   :  { %1516 = shalt.err (!%p1513_p7)
}
  0x12   :  { %s1592_s22 = smov 128   ;;  %s1593_s23 = smov 8  }
  0x13   :  { %24 = dma.hbm_to_vmem [thread:$0]  %s1897_s0, 1024, %s19_s13, [#allocation5], %s1592_s22, %s1592_s22, %s1593_s23  }
  0x14   :  { %s1594_s26 = smov [#allocation7]   ;;  %s1517_s30 = scalar_lea.hbm %s1898_s1, 2048 }
  0x15   :  { %s30_s27 = sshll.u32 %s1594_s26, 4  ;;  %p1518_p8 = scmp.ne.s32.totalorder %s1898_s1, %s1517_s30  ;;  %s31_s27 = int_to_ptr.vmem [resolvable:$true] %s30_s27 }
  0x16   :  { %p1521_p9 = scmp.lt.u32.totalorder %s1517_s30, %s1898_s1 }
  0x18   :  { %p1523_p10 = pnand %p1521_p9, %p1518_p8 }
  0x1a   :  { %1526 = shalt.err (!%p1523_p10)
}
  0x1b   :  { %s1527_s8 = scalar_lea.vmem %s31_s27, 2048  ;;  %p1532_p12 = scmp.lt.s32.totalorder %s31_s27, %s31_s27 }
  0x1c   :  { %p1528_p11 = scmp.ne.s32.totalorder %s31_s27, %s1527_s8  ;;  %p1533_p13 = scmp.lt.s32.totalorder %s1527_s8, %s1527_s8 }
  0x1e   :  { %p1534_p0 = por %p1533_p13, %p1532_p12 }
  0x20   :  { %p1535_p1 = pnand %p1534_p0, %p1528_p11 }
  0x22   :  { %1538 = shalt.err (!%p1535_p1)
}
  0x23   :  { %36 = dma.hbm_to_vmem [thread:$0]  %s1898_s1, 2048, %s31_s27, [#allocation8], %s1592_s22, %s1592_s22, %s1593_s23  }
  0x24   :  { %1583 = dma.done.wait [#allocation5], 1024  }
  0x25   :  { %1584 = vsyncadd [#allocation5], 4294966272 }
  0x26   :  { %1585 = dma.done.wait [#allocation8], 2048  }
  0x27   :  { %1586 = vsyncadd [#allocation8], 4294965248  ;;  %v1595_v0 = vmov 0.0|0.0   ;;  %vm1596_vm0 = vmmov 0   ;;  %v1597_v1 = vmov 0.0   ;;  %v48_v2 = vld [vmem:[#allocation7] sm:$0xff]  ;;  %v685_v47 = vlaneseq }
  0x28   :  { %1276 = vmatprep.subr.bf16.mxu0 %v1595_v0  ;;  %1028 = vmatprep.mubr.msk.f32.mxu0 %vm1596_vm0, %v1597_v1  ;;  %v49_v3 = vld [vmem:[#allocation7 + $0x8] sm:$0xff]  ;;  %v50_v4 = vld [vmem:[#allocation7 + $0x10] sm:$0xff]  ;;  %v51_v6 = vld [vmem:[#allocation7 + $0x18] sm:$0xff]  ;;  %v1598_v45 = vmov 1983009808   ;;  %s1600_s1 = smov [#allocation10]  }
  0x29   :  { %1300 = vmatprep.subr.bf16.mxu1 %v1595_v0  ;;  %1063 = vmatprep.mubr.msk.f32.mxu1 %vm1596_vm0, %v1597_v1  ;;  %v1658_v5 = vpack.c.bf16 %v49_v3, %v48_v2  ;;  %v1661_v7 = vpack.c.bf16 %v51_v6, %v50_v4  ;;  %v52_v8 = vld [vmem:[#allocation7 + $0x20] sm:$0xff]  ;;  %v53_v9 = vld [vmem:[#allocation7 + $0x28] sm:$0xff]  ;;  %v54_v11 = vld [vmem:[#allocation7 + $0x30] sm:$0xff]  ;;  %v683_v46 = vunpack.c.l.s4 %v1598_v45  ;;  %v1785_v49 = vshrl.u32 %v685_v47, 7  ;;  %s846_s10 = sshll.u32 %s1600_s1, 4  ;;  %s847_s10 = int_to_ptr.vmem [resolvable:$true] %s846_s10 }
  0x2a   :  { %v1667_v10 = vpack.c.bf16 %v53_v9, %v52_v8  ;;  %v55_v12 = vld [vmem:[#allocation7 + $0x38] sm:$0xff]  ;;  %v56_v14 = vld [vmem:[#allocation7 + $0x40] sm:$0xff]  ;;  %v57_v15 = vld [vmem:[#allocation7 + $0x48] sm:$0xff]  ;;  %s1539_s11 = scalar_lea.vmem %s847_s10, 128  ;;  %p1544_p3 = scmp.lt.s32.totalorder %s847_s10, %s847_s10 }
  0x2b   :  { %1278 = vmatpush3.bf16.msra.mxu0 %v1658_v5  ;;  %1302 = vmatpush3.bf16.msra.mxu1 %v1658_v5  ;;  %v1673_v13 = vpack.c.bf16 %v55_v12, %v54_v11  ;;  %v1679_v16 = vpack.c.bf16 %v57_v15, %v56_v14  ;;  %v58_v17 = vld [vmem:[#allocation7 + $0x50] sm:$0xff]  ;;  %v59_v18 = vld [vmem:[#allocation7 + $0x58] sm:$0xff]  ;;  %v60_v20 = vld [vmem:[#allocation7 + $0x60] sm:$0xff]  ;;  %v684_v48 = vunpack.c.0.s8 %v683_v46  ;;  %p1540_p2 = scmp.ne.s32.totalorder %s847_s10, %s1539_s11  ;;  %p1545_p4 = scmp.lt.s32.totalorder %s1539_s11, %s1539_s11 }
  0x2c   :  { %1279 = vmatprep.subr.bf16.mxu0 %v1595_v0  ;;  %1303 = vmatprep.subr.bf16.mxu1 %v1595_v0  ;;  %v1685_v19 = vpack.c.bf16 %v59_v18, %v58_v17  ;;  %v61_v21 = vld [vmem:[#allocation7 + $0x68] sm:$0xff]  ;;  %v62_v23 = vld [vmem:[#allocation7 + $0x70] sm:$0xff]  ;;  %v63_v24 = vld [vmem:[#allocation7 + $0x78] sm:$0xff] }
  0x2d   :  { %v1691_v22 = vpack.c.bf16 %v61_v21, %v60_v20  ;;  %v1697_v25 = vpack.c.bf16 %v63_v24, %v62_v23  ;;  %v65_v26 = vld [vmem:[#allocation4] sm:$0xff]  ;;  %v140_v31 = vld [vmem:[#allocation4 + $0x8] sm:$0xff]  ;;  %v216_v36 = vld [vmem:[#allocation4 + $0x10] sm:$0xff]  ;;  %v1790_v52 = vsub.s32 %v684_v48, %v1785_v49  ;;  %p1546_p5 = por %p1545_p4, %p1544_p3 }
  0x2e   :  { %v292_v41 = vld [vmem:[#allocation4 + $0x18] sm:$0xff]  ;;  %v368_v2 = vld [vmem:[#allocation4 + $0x20] sm:$0xff]  ;;  %v520_v11 = vld [vmem:[#allocation4 + $0x30] sm:$0xff] }
  0x2f   :  { %1281 = vmatpush3.bf16.msra.mxu0 %v1661_v7  ;;  %1305 = vmatpush3.bf16.msra.mxu1 %v1661_v7  ;;  %p1547_p6 = pnand %p1546_p5, %p1540_p2 }
  0x30   :  { %1282 = vmatprep.subr.bf16.mxu0 %v1595_v0  ;;  %1306 = vmatprep.subr.bf16.mxu1 %v1595_v0 }
  0x33   :  { %1284 = vmatpush3.bf16.msra.mxu0 %v1667_v10  ;;  %1308 = vmatpush3.bf16.msra.mxu1 %v1667_v10 }
  0x34   :  { %1285 = vmatprep.subr.bf16.mxu0 %v1595_v0  ;;  %1309 = vmatprep.subr.bf16.mxu1 %v1595_v0 }
  0x37   :  { %1287 = vmatpush3.bf16.msra.mxu0 %v1673_v13  ;;  %1311 = vmatpush3.bf16.msra.mxu1 %v1673_v13 }
  0x38   :  { %1288 = vmatprep.subr.bf16.mxu0 %v1595_v0  ;;  %1312 = vmatprep.subr.bf16.mxu1 %v1595_v0 }
  0x3b   :  { %1290 = vmatpush3.bf16.msra.mxu0 %v1679_v16  ;;  %1314 = vmatpush3.bf16.msra.mxu1 %v1679_v16 }
  0x3c   :  { %1291 = vmatprep.subr.bf16.mxu0 %v1595_v0  ;;  %1315 = vmatprep.subr.bf16.mxu1 %v1595_v0 }
  0x3f   :  { %1293 = vmatpush3.bf16.msra.mxu0 %v1685_v19  ;;  %1317 = vmatpush3.bf16.msra.mxu1 %v1685_v19 }
  0x40   :  { %1294 = vmatprep.subr.bf16.mxu0 %v1595_v0  ;;  %1318 = vmatprep.subr.bf16.mxu1 %v1595_v0 }
  0x43   :  { %1296 = vmatpush3.bf16.msra.mxu0 %v1691_v22  ;;  %1320 = vmatpush3.bf16.msra.mxu1 %v1691_v22 }
  0x44   :  { %1297 = vmatprep.subr.bf16.mxu0 %v1595_v0  ;;  %1321 = vmatprep.subr.bf16.mxu1 %v1595_v0 }
  0x47   :  { %1299 = vmatpush3.bf16.msra.mxu0 %v1697_v25  ;;  %1323 = vmatpush3.bf16.msra.mxu1 %v1697_v25 }
  0x48   :  { %1324 = vmatprep.subr.bf16.mxu0 %v1595_v0  ;;  %1348 = vmatprep.subr.bf16.mxu1 %v1595_v0 }
  0x4a   :  { %1029 = vmatmul.mubr.f32.vlgmr.msra.gmra.mrb[0].mxu0 %v1597_v1 }
  0x4b   :  { %1326 = vmatpush3.bf16.msra.mxu0 %v1658_v5  ;;  %1098 = vmatprep.mubr.msk.f32.mxu0 %vm1596_vm0, %v1597_v1 }
  0x4c   :  { %1327 = vmatprep.subr.bf16.mxu0 %v1595_v0 }
  0x4f   :  { %1329 = vmatpush3.bf16.msra.mxu0 %v1661_v7 }
  0x50   :  { %1330 = vmatprep.subr.bf16.mxu0 %v1595_v0 }
  0x53   :  { %1332 = vmatpush3.bf16.msra.mxu0 %v1667_v10 }
  0x54   :  { %1333 = vmatprep.subr.bf16.mxu0 %v1595_v0 }
  0x57   :  { %1335 = vmatpush3.bf16.msra.mxu0 %v1673_v13 }
  0x58   :  { %1336 = vmatprep.subr.bf16.mxu0 %v1595_v0 }
  0x5b   :  { %1338 = vmatpush3.bf16.msra.mxu0 %v1679_v16 }
  0x5c   :  { %1339 = vmatprep.subr.bf16.mxu0 %v1595_v0 }
  0x5f   :  { %1341 = vmatpush3.bf16.msra.mxu0 %v1685_v19 }
  0x60   :  { %1342 = vmatprep.subr.bf16.mxu0 %v1595_v0 }
  0x63   :  { %1344 = vmatpush3.bf16.msra.mxu0 %v1691_v22 }
  0x64   :  { %1345 = vmatprep.subr.bf16.mxu0 %v1595_v0 }
  0x67   :  { %1347 = vmatpush3.bf16.msra.mxu0 %v1697_v25 }
  0x68   :  { %1372 = vmatprep.subr.bf16.mxu0 %v1595_v0 }
 0x11d   :  { %v132_v27 = vpop.f32.mrb[0].mxu0 }
 0x11e   :  { %v136_v28 = vadd.f32 %v132_v27, %v65_v26  ;;  %v1030_v29 = vpop.f32.mrb[1].mxu0 }
 0x120   :  { %1479 = vtanh.f32 %v136_v28 }
 0x12a   :  { %v1725_v30 = vpop.eup %1479 }
 0x12b   :  { %1064 = vmatmul.mubr.f32.vlgmr.msra.gmra.mrb[0].mxu1 %v1725_v30 }
 0x12c   :  { %1350 = vmatpush3.bf16.msra.mxu1 %v1658_v5  ;;  %1133 = vmatprep.mubr.msk.f32.mxu1 %vm1596_vm0, %v1597_v1 }
 0x12d   :  { %1351 = vmatprep.subr.bf16.mxu1 %v1595_v0 }
 0x130   :  { %1353 = vmatpush3.bf16.msra.mxu1 %v1661_v7 }
 0x131   :  { %1354 = vmatprep.subr.bf16.mxu1 %v1595_v0 }
 0x134   :  { %1356 = vmatpush3.bf16.msra.mxu1 %v1667_v10 }
 0x135   :  { %1357 = vmatprep.subr.bf16.mxu1 %v1595_v0 }
 0x138   :  { %1359 = vmatpush3.bf16.msra.mxu1 %v1673_v13 }
 0x139   :  { %1360 = vmatprep.subr.bf16.mxu1 %v1595_v0 }
 0x13c   :  { %1362 = vmatpush3.bf16.msra.mxu1 %v1679_v16 }
 0x13d   :  { %1363 = vmatprep.subr.bf16.mxu1 %v1595_v0 }
 0x140   :  { %1365 = vmatpush3.bf16.msra.mxu1 %v1685_v19 }
 0x141   :  { %1366 = vmatprep.subr.bf16.mxu1 %v1595_v0 }
 0x144   :  { %1368 = vmatpush3.bf16.msra.mxu1 %v1691_v22 }
 0x145   :  { %1369 = vmatprep.subr.bf16.mxu1 %v1595_v0 }
 0x148   :  { %1371 = vmatpush3.bf16.msra.mxu1 %v1697_v25 }
 0x149   :  { %1396 = vmatprep.subr.bf16.mxu1 %v1595_v0 }
 0x1fe   :  { %v207_v32 = vpop.f32.mrb[0].mxu1 }
 0x1ff   :  { %v211_v33 = vadd.f32 %v207_v32, %v140_v31  ;;  %v1065_v34 = vpop.f32.mrb[1].mxu1 }
 0x201   :  { %1481 = vtanh.f32 %v211_v33 }
 0x20b   :  { %v1746_v35 = vpop.eup %1481 }
 0x20c   :  { %1099 = vmatmul.mubr.f32.vlgmr.msra.gmra.mrb[2].mxu0 %v1746_v35 }
 0x20d   :  { %1374 = vmatpush3.bf16.msra.mxu0 %v1658_v5  ;;  %1168 = vmatprep.mubr.msk.f32.mxu0 %vm1596_vm0, %v1597_v1 }
 0x20e   :  { %1375 = vmatprep.subr.bf16.mxu0 %v1595_v0 }
 0x211   :  { %1377 = vmatpush3.bf16.msra.mxu0 %v1661_v7 }
 0x212   :  { %1378 = vmatprep.subr.bf16.mxu0 %v1595_v0 }
 0x215   :  { %1380 = vmatpush3.bf16.msra.mxu0 %v1667_v10 }
 0x216   :  { %1381 = vmatprep.subr.bf16.mxu0 %v1595_v0 }
 0x219   :  { %1383 = vmatpush3.bf16.msra.mxu0 %v1673_v13 }
 0x21a   :  { %1384 = vmatprep.subr.bf16.mxu0 %v1595_v0 }
 0x21d   :  { %1386 = vmatpush3.bf16.msra.mxu0 %v1679_v16 }
 0x21e   :  { %1387 = vmatprep.subr.bf16.mxu0 %v1595_v0 }
 0x221   :  { %1389 = vmatpush3.bf16.msra.mxu0 %v1685_v19 }
 0x222   :  { %1390 = vmatprep.subr.bf16.mxu0 %v1595_v0 }
 0x225   :  { %1392 = vmatpush3.bf16.msra.mxu0 %v1691_v22 }
 0x226   :  { %1393 = vmatprep.subr.bf16.mxu0 %v1595_v0 }
 0x229   :  { %1395 = vmatpush3.bf16.msra.mxu0 %v1697_v25 }
 0x22a   :  { %1420 = vmatprep.subr.bf16.mxu0 %v1595_v0 }
 0x2df   :  { %v283_v37 = vpop.f32.mrb[2].mxu0 }
 0x2e0   :  { %v287_v38 = vadd.f32 %v283_v37, %v216_v36  ;;  %v1100_v39 = vpop.f32.mrb[3].mxu0 }
 0x2e2   :  { %1483 = vtanh.f32 %v287_v38 }
 0x2ec   :  { %v1484_v40 = vpop.eup %1483 }
 0x2ed   :  { %1134 = vmatmul.mubr.f32.vlgmr.msra.gmra.mrb[2].mxu1 %v1484_v40  ;;  %v680_v50 = vcombine.low %v1725_v30, %v1484_v40  ;;  %v681_v51 = vcombine.high %v1725_v30, %v1484_v40 }
 0x2ee   :  { %1398 = vmatpush3.bf16.msra.mxu1 %v1658_v5  ;;  %1203 = vmatprep.mubr.msk.f32.mxu1 %vm1596_vm0, %v1597_v1 }
 0x2ef   :  { %1399 = vmatprep.subr.bf16.mxu1 %v1595_v0  ;;  %v1798_v56 = vrot.slane %v680_v50, %v1790_v52  ;;  %v1801_v57 = vrot.slane %v681_v51, %v1790_v52 }
 0x2f2   :  { %1401 = vmatpush3.bf16.msra.mxu1 %v1661_v7 }
 0x2f3   :  { %1402 = vmatprep.subr.bf16.mxu1 %v1595_v0 }
 0x2f6   :  { %1404 = vmatpush3.bf16.msra.mxu1 %v1667_v10 }
 0x2f7   :  { %1405 = vmatprep.subr.bf16.mxu1 %v1595_v0 }
 0x2fa   :  { %1407 = vmatpush3.bf16.msra.mxu1 %v1673_v13 }
 0x2fb   :  { %1408 = vmatprep.subr.bf16.mxu1 %v1595_v0 }
 0x2fe   :  { %1410 = vmatpush3.bf16.msra.mxu1 %v1679_v16 }
 0x2ff   :  { %1411 = vmatprep.subr.bf16.mxu1 %v1595_v0 }
 0x302   :  { %1413 = vmatpush3.bf16.msra.mxu1 %v1685_v19 }
 0x303   :  { %1414 = vmatprep.subr.bf16.mxu1 %v1595_v0 }
 0x306   :  { %1416 = vmatpush3.bf16.msra.mxu1 %v1691_v22 }
 0x307   :  { %1417 = vmatprep.subr.bf16.mxu1 %v1595_v0 }
 0x30a   :  { %1419 = vmatpush3.bf16.msra.mxu1 %v1697_v25 }
 0x30b   :  { %1444 = vmatprep.subr.bf16.mxu1 %v1595_v0 }
 0x3c0   :  { %v359_v42 = vpop.f32.mrb[2].mxu1 }
 0x3c1   :  { %v363_v43 = vadd.f32 %v359_v42, %v292_v41  ;;  %v1135_v44 = vpop.f32.mrb[3].mxu1 }
 0x3c3   :  { %1485 = vtanh.f32 %v363_v43 }
 0x3cd   :  { %v1486_v53 = vpop.eup %1485 }
 0x3ce   :  { %v696_v54 = vcombine.low %v1746_v35, %v1486_v53  ;;  %v697_v55 = vcombine.high %v1746_v35, %v1486_v53  ;;  %1169 = vmatmul.mubr.f32.vlgmr.msra.gmra.mrb[4].mxu0 %v1486_v53 }
 0x3cf   :  { %1422 = vmatpush3.bf16.msra.mxu0 %v1658_v5  ;;  %1238 = vmatprep.mubr.msk.f32.mxu0 %vm1596_vm0, %v1597_v1 }
 0x3d0   :  { %v1804_v58 = vrot.slane %v696_v54, %v1790_v52  ;;  %v1807_v59 = vrot.slane %v697_v55, %v1790_v52  ;;  %1423 = vmatprep.subr.bf16.mxu0 %v1595_v0 }
 0x3d2   :  { %v744_v60 = vcombine.low %v1798_v56, %v1804_v58  ;;  %v745_v61 = vcombine.high %v1798_v56, %v1804_v58  ;;  %v760_v62 = vcombine.low %v1801_v57, %v1807_v59  ;;  %v761_v63 = vcombine.high %v1801_v57, %v1807_v59 }
 0x3d3   :  { %1425 = vmatpush3.bf16.msra.mxu0 %v1661_v7 }
 0x3d4   :  { %1426 = vmatprep.subr.bf16.mxu0 %v1595_v0 }
 0x3d7   :  { %1428 = vmatpush3.bf16.msra.mxu0 %v1667_v10 }
 0x3d8   :  { %1429 = vmatprep.subr.bf16.mxu0 %v1595_v0 }
 0x3db   :  { %1431 = vmatpush3.bf16.msra.mxu0 %v1673_v13 }
 0x3dc   :  { %1432 = vmatprep.subr.bf16.mxu0 %v1595_v0 }
 0x3df   :  { %1434 = vmatpush3.bf16.msra.mxu0 %v1679_v16 }
 0x3e0   :  { %1435 = vmatprep.subr.bf16.mxu0 %v1595_v0 }
 0x3e3   :  { %1437 = vmatpush3.bf16.msra.mxu0 %v1685_v19 }
 0x3e4   :  { %1438 = vmatprep.subr.bf16.mxu0 %v1595_v0 }
 0x3e7   :  { %1440 = vmatpush3.bf16.msra.mxu0 %v1691_v22 }
 0x3e8   :  { %1441 = vmatprep.subr.bf16.mxu0 %v1595_v0 }
 0x3eb   :  { %1443 = vmatpush3.bf16.msra.mxu0 %v1697_v25 }
 0x4a1   :  { %v435_v3 = vpop.f32.mrb[4].mxu0 }
 0x4a2   :  { %v439_v4 = vadd.f32 %v435_v3, %v368_v2  ;;  %v1170_v6 = vpop.f32.mrb[5].mxu0 }
 0x4a4   :  { %1487 = vtanh.f32 %v439_v4 }
 0x4ae   :  { %v1831_v8 = vpop.eup %1487 }
 0x4af   :  { %1204 = vmatmul.mubr.f32.vlgmr.msra.gmra.mrb[4].mxu1 %v1831_v8 }
 0x4b0   :  { %1446 = vmatpush3.bf16.msra.mxu1 %v1658_v5  ;;  %1273 = vmatprep.mubr.msk.f32.mxu1 %vm1596_vm0, %v1597_v1  ;;  %v444_v1 = vld [vmem:[#allocation4 + $0x28] sm:$0xff] }
 0x4b1   :  { %1447 = vmatprep.subr.bf16.mxu1 %v1595_v0 }
 0x4b4   :  { %1449 = vmatpush3.bf16.msra.mxu1 %v1661_v7 }
 0x4b5   :  { %1450 = vmatprep.subr.bf16.mxu1 %v1595_v0 }
 0x4b8   :  { %1452 = vmatpush3.bf16.msra.mxu1 %v1667_v10 }
 0x4b9   :  { %1453 = vmatprep.subr.bf16.mxu1 %v1595_v0 }
 0x4bc   :  { %1455 = vmatpush3.bf16.msra.mxu1 %v1673_v13 }
 0x4bd   :  { %1456 = vmatprep.subr.bf16.mxu1 %v1595_v0 }
 0x4c0   :  { %1458 = vmatpush3.bf16.msra.mxu1 %v1679_v16  ;;  %v596_v16 = vld [vmem:[#allocation4 + $0x38] sm:$0xff] }
 0x4c1   :  { %1459 = vmatprep.subr.bf16.mxu1 %v1595_v0 }
 0x4c4   :  { %1461 = vmatpush3.bf16.msra.mxu1 %v1685_v19  ;;  %v1599_v19 = vmov 1934713408  }
 0x4c5   :  { %1462 = vmatprep.subr.bf16.mxu1 %v1595_v0  ;;  %v747_v20 = vunpack.c.l.s4 %v1599_v19 }
 0x4c7   :  { %v748_v21 = vunpack.c.0.s8 %v747_v20 }
 0x4c8   :  { %1464 = vmatpush3.bf16.msra.mxu1 %v1691_v22 }
 0x4c9   :  { %1465 = vmatprep.subr.bf16.mxu1 %v1595_v0  ;;  %v751_v27 = vsub.s32 %v748_v21, %v1785_v49 }
 0x4cc   :  { %1467 = vmatpush3.bf16.msra.mxu1 %v1697_v25 }
 0x582   :  { %v511_v5 = vpop.f32.mrb[4].mxu1 }
 0x583   :  { %v515_v7 = vadd.f32 %v511_v5, %v444_v1  ;;  %v1205_v9 = vpop.f32.mrb[5].mxu1 }
 0x585   :  { %1489 = vtanh.f32 %v515_v7 }
 0x58f   :  { %v1490_v10 = vpop.eup %1489 }
 0x590   :  { %1239 = vmatmul.mubr.f32.vlgmr.msra.gmra.mrb[6].mxu0 %v1490_v10 }
 0x663   :  { %v587_v12 = vpop.f32.mrb[6].mxu0 }
 0x664   :  { %v591_v13 = vadd.f32 %v587_v12, %v520_v11  ;;  %v1240_v14 = vpop.f32.mrb[7].mxu0 }
 0x666   :  { %1491 = vtanh.f32 %v591_v13 }
 0x670   :  { %v1492_v15 = vpop.eup %1491 }
 0x671   :  { %1274 = vmatmul.mubr.f32.vlgmr.msra.gmra.mrb[6].mxu1 %v1492_v15  ;;  %v712_v22 = vcombine.low %v1831_v8, %v1492_v15  ;;  %v713_v23 = vcombine.high %v1831_v8, %v1492_v15 }
 0x744   :  { %v663_v17 = vpop.f32.mrb[6].mxu1 }
 0x745   :  { %v667_v18 = vadd.f32 %v663_v17, %v596_v16  ;;  %v1275_v0 = vpop.f32.mrb[7].mxu1 }
 0x747   :  { %1493 = vtanh.f32 %v667_v18 }
 0x751   :  { %v1494_v24 = vpop.eup %1493 }
 0x752   :  { %v728_v25 = vcombine.low %v1490_v10, %v1494_v24  ;;  %v729_v26 = vcombine.high %v1490_v10, %v1494_v24  ;;  %827 = vst [vmem:[#allocation10] sm:$0xff] %v1494_v24 }
 0x753   :  { %1550 = shalt.err (!%p1547_p6)
}
 0x754   :  { %s1551_s14 = scalar_lea.hbm %s1900_s3, 128 }
 0x755   :  { %p1552_p7 = scmp.ne.s32.totalorder %s1900_s3, %s1551_s14  ;;  %p1555_p8 = scmp.lt.u32.totalorder %s1551_s14, %s1900_s3 }
 0x757   :  { %p1557_p9 = pnand %p1555_p8, %p1552_p7 }
 0x759   :  { %1560 = shalt.err (!%p1557_p9)
}
 0x75a   :  { %849 = dma.vmem_to_hbm [thread:$0]  %s847_s10, 128, %s1900_s3, [#allocation11]   ;;  %v720_v28 = vrot.slane %v712_v22, %v1790_v52  ;;  %v727_v29 = vrot.slane %v713_v23, %v1790_v52  ;;  %v736_v30 = vrot.slane %v728_v25, %v1790_v52  ;;  %v743_v31 = vrot.slane %v729_v26, %v1790_v52 }
 0x75b   :  { %v752_v36 = vrot.slane %v744_v60, %v751_v27  ;;  %v759_v37 = vrot.slane %v745_v61, %v751_v27  ;;  %s1601_s3 = smov [#allocation9]   ;;  %v768_v42 = vrot.slane %v760_v62, %v751_v27  ;;  %v775_v43 = vrot.slane %v761_v63, %v751_v27 }
 0x75c   :  { %v776_v32 = vcombine.low %v720_v28, %v736_v30  ;;  %v777_v33 = vcombine.high %v720_v28, %v736_v30  ;;  %v792_v34 = vcombine.low %v727_v29, %v743_v31  ;;  %v793_v35 = vcombine.high %v727_v29, %v743_v31  ;;  %s833_s21 = sshll.u32 %s1601_s3, 4  ;;  %s834_s21 = int_to_ptr.vmem [resolvable:$true] %s833_s21 }
 0x75d   :  { %s1561_s24 = scalar_lea.vmem %s834_s21, 1024  ;;  %p1566_p11 = scmp.lt.s32.totalorder %s834_s21, %s834_s21 }
 0x75e   :  { %v784_v38 = vrot.slane %v776_v32, %v751_v27  ;;  %v791_v39 = vrot.slane %v777_v33, %v751_v27  ;;  %v800_v40 = vrot.slane %v792_v34, %v751_v27  ;;  %v807_v41 = vrot.slane %v793_v35, %v751_v27  ;;  %p1562_p10 = scmp.ne.s32.totalorder %s834_s21, %s1561_s24  ;;  %p1567_p12 = scmp.lt.s32.totalorder %s1561_s24, %s1561_s24 }
 0x760   :  { %v808_v44 = vcombine.low %v752_v36, %v784_v38  ;;  %v809_v45 = vcombine.high %v752_v36, %v784_v38  ;;  %v810_v46 = vcombine.low %v759_v37, %v791_v39  ;;  %v811_v47 = vcombine.high %v759_v37, %v791_v39  ;;  %p1568_p13 = por %p1567_p12, %p1566_p11 }
 0x761   :  { %v812_v48 = vcombine.low %v768_v42, %v800_v40  ;;  %v813_v49 = vcombine.high %v768_v42, %v800_v40  ;;  %v814_v50 = vcombine.low %v775_v43, %v807_v41  ;;  %v815_v51 = vcombine.high %v775_v43, %v807_v41 }
 0x762   :  { %816 = vst [vmem:[#allocation9] sm:$0xff] %v808_v44  ;;  %817 = vst [vmem:[#allocation9 + $0x8] sm:$0xff] %v809_v45  ;;  %p1569_p0 = pnand %p1568_p13, %p1562_p10 }
 0x763   :  { %818 = vst [vmem:[#allocation9 + $0x10] sm:$0xff] %v810_v46  ;;  %819 = vst [vmem:[#allocation9 + $0x18] sm:$0xff] %v811_v47 }
 0x764   :  { %820 = vst [vmem:[#allocation9 + $0x20] sm:$0xff] %v812_v48  ;;  %821 = vst [vmem:[#allocation9 + $0x28] sm:$0xff] %v813_v49 }
 0x765   :  { %822 = vst [vmem:[#allocation9 + $0x30] sm:$0xff] %v814_v50  ;;  %823 = vst [vmem:[#allocation9 + $0x38] sm:$0xff] %v815_v51 }
 0x766   :  { %1572 = shalt.err (!%p1569_p0)
}
 0x767   :  { %s1573_s27 = scalar_lea.hbm %s1899_s2, 1024 }
 0x768   :  { %p1574_p1 = scmp.ne.s32.totalorder %s1899_s2, %s1573_s27  ;;  %p1577_p2 = scmp.lt.u32.totalorder %s1573_s27, %s1899_s2 }
 0x76a   :  { %p1579_p3 = pnand %p1577_p2, %p1574_p1 }
 0x76c   :  { %1582 = shalt.err (!%p1579_p3)
}
 0x76d   :  { %839 = dma.vmem_to_hbm [thread:$0]  %s834_s21, 1024, %s1899_s2, [#allocation6], %s1592_s22, %s1592_s22, %s1593_s23  }
 0x76e   :  { %1587 = dma.done.wait [#allocation6], 1024  }
 0x76f   :  { %1588 = vsyncadd [#allocation6], 4294966272 }
 0x770   :  { %1589 = dma.done.wait [#allocation11], 128  }
 0x771   :  { %1590 = vsyncadd [#allocation11], 4294967168 }
 0x772   :  { %856 = vsyncpa [#allocation5], 1 }
 0x773   :  { %857 = vsyncpa [#allocation8], 1 }
 0x774   :  { %858 = vsyncpa [#allocation6], 1 }
 0x775   :  { %859 = vsyncpa [#allocation11], 1 }

</bundles_post_ra>
